<compile_context>
chip_gen: v5e
topology: v5e:2x2
jax: 0.10.0
libtpu: 0.0.40
codegen_flags: <defaults>
</compile_context>

<pallas_src>
import math

import jax
import jax.numpy as jnp
from jax.experimental import pallas as pl
from jax.experimental.pallas import tpu as pltpu

KH = KW = 3        # 3x3 conv, stride 1, SAME padding
SUBLANES = 8       # f32 sublane group; Cin is zero-padded up to a multiple of this
LANES = 128


def _pick_row_stride(H, W):
    """Smallest padded row width Wp >= W+2 with H*Wp a multiple of 128 (fully unmasked
    output stores), as long as the extra junk columns are cheap; else fall back to W+2."""
    Wp = W + 2
    step = LANES // math.gcd(H, LANES)
    aligned = ((Wp + step - 1) // step) * step
    return aligned if aligned - Wp <= 8 else Wp


def _pick_images_per_step(N):
    """Largest divisor of N that still leaves >= 2 grid steps (keeps both v7x TCs busy)."""
    if N <= 2:
        return 1
    for nb in range(N // 2, 0, -1):
        if N % nb == 0 and N // nb >= 2:
            return nb
    return 1


def _make_pipeline_kernel(Nb, H, Wp, Cpad, Cout):
    HWp = H * Wp

    def pipeline_kernel(x_ref, w_ref, b_ref, o_ref):
        # x_ref: (Nb, Cpad, L) f32   flattened padded images, L = (H+3)*Wp
        # w_ref: (Cout, KH*KW*Cpad) bf16, column order [ky][kx][c]
        # b_ref: (Cout, 1) f32
        # o_ref: (Nb, Cout, H*Wp) f32, lane-dense channel-major output (H*Wp % 128 == 0)

        # --- pre_process: Identity (default) -> no-op ---
        bias = b_ref[...]                                   # hoisted out of the Nb loop

        for b in range(Nb):                                 # static unroll, Nb is small
            x = x_ref[b]                                    # (Cpad, L)

            # --- model: Conv2d(3x3, pad=1) + bias + ReLU as ONE im2col matmul ---
            # Each tap is a lane-offset view of the flat padded image.  Cpad % 8 == 0
            # makes every tap a whole sublane group, so this concatenate is pure vreg
            # block stacking (no sublane shuffles / VMEM copies).
            cols = []
            for dy in range(KH):
                for dx in range(KW):
                    off = dy * Wp + dx
                    cols.append(x[:, off:off + HWp])        # (Cpad, HWp)
            patches = jnp.concatenate(cols, axis=0)         # (KH*KW*Cpad, HWp)

            # bf16 operands, f32 accumulation -> ~2x MXU throughput on all generations.
            acc = jnp.dot(w_ref[...], patches.astype(jnp.bfloat16),
                          preferred_element_type=jnp.float32)       # (Cout, HWp)
            acc = jnp.maximum(acc + bias, 0.0)                       # bias + ReLU

            # --- post_process: Identity (default) -> no-op ---
            o_ref[b] = acc.astype(o_ref.dtype)

    return pipeline_kernel


def convertable_complete_pipeline(x_nchw, weight_oihw, bias, images_per_step=None):
    """x_nchw: (N, Cin, H, W) f32 -> (N, Cout, H, W) f32  (== ReLU(conv3x3_same(x) + b))."""
    N, Cin, H, W = x_nchw.shape
    Cout = weight_oihw.shape[0]
    assert Cout % SUBLANES == 0, "toy model uses a sublane-aligned Cout"

    Cpad = ((Cin + SUBLANES - 1) // SUBLANES) * SUBLANES
    Wp = _pick_row_stride(H, W)          # padded row stride (>= W+2), lane-aligned output
    HWp = H * Wp
    # 1 top pad row, 1 real bottom pad row (SAME), plus 1 slack row so every tap's
    # lane-offset slice of length H*Wp stays in bounds (slack never reaches valid columns).
    L = (H + 3) * Wp

    Nb = images_per_step or _pick_images_per_step(N)
    assert N % Nb == 0

    # ONE fused pad (single HBM round trip): channel pad to a sublane multiple + SAME
    # spatial pad (1 top / 2 bottom rows, 1 left / Wp-W-1 right cols), then a free
    # contiguous reshape.  NO transposes of x.
    x_pad = jnp.pad(x_nchw, ((0, 0), (0, Cpad - Cin), (1, 2), (1, Wp - W - 1)))
    x_flat = x_pad.reshape(N, Cpad, L)                      # (N, Cpad, L), free reshape

    # Conv taps flattened with column order [ky][kx][c] (matches kernel patch rows),
    # zero-padded channels, bf16 MXU operand.
    w_pad = jnp.pad(weight_oihw, ((0, 0), (0, Cpad - Cin), (0, 0), (0, 0)))
    w_mat = jnp.transpose(w_pad, (0, 2, 3, 1)).reshape(Cout, KH * KW * Cpad)
    w_mat = w_mat.astype(jnp.bfloat16)
    b_mat = bias.reshape(Cout, 1).astype(jnp.float32)

    kernel = _make_pipeline_kernel(Nb, H, Wp, Cpad, Cout)

    out_flat = pl.pallas_call(
        kernel,
        out_shape=jax.ShapeDtypeStruct((N, Cout, HWp), jnp.float32),
        grid_spec=pltpu.PrefetchScalarGridSpec(
            num_scalar_prefetch=0,
            grid=(N // Nb,),
            in_specs=[
                pl.BlockSpec((Nb, Cpad, L), lambda n: (n, 0, 0)),
                pl.BlockSpec((Cout, KH * KW * Cpad), lambda n: (0, 0)),
                pl.BlockSpec((Cout, 1), lambda n: (0, 0)),
            ],
            out_specs=pl.BlockSpec((Nb, Cout, HWp), lambda n: (n, 0, 0)),
        ),
        compiler_params=pltpu.CompilerParams(
            dimension_semantics=("parallel",),   # images are independent; shards across TCs
        ),
    )(x_flat, w_mat, b_mat)

    # Free reshape, then drop the junk columns per row (w >= W).  Result is already NCHW.
    # TODO(synk): at scale keep the padded-Wp layout for the consumer / fuse this crop.
    return out_flat.reshape(N, Cout, H, Wp)[:, :, :, :W]


def _reference(x_nchw, weight_oihw, bias):
    y = jax.lax.conv_general_dilated(
        x_nchw, weight_oihw, window_strides=(1, 1), padding="SAME",
        dimension_numbers=("NCHW", "OIHW", "NCHW"),
    )
    return jnp.maximum(y + bias[None, :, None, None], 0.0)


if __name__ == "__main__":
    key = jax.random.PRNGKey(0)
    kx, kw, kb = jax.random.split(key, 3)

    N, Cin, H, W = 2, 4, 16, 16
    Cout = 8

    x = jax.random.normal(kx, (N, Cin, H, W), dtype=jnp.float32)
    # Deterministic synthetic weights (model.eval(): no BN/dropout state to worry about).
    weight = jax.random.normal(kw, (Cout, Cin, KH, KW), dtype=jnp.float32) * 0.1
    bias = jax.random.normal(kb, (Cout,), dtype=jnp.float32) * 0.1

    out = jax.block_until_ready(convertable_complete_pipeline(x, weight, bias))
    ref = _reference(x, weight, bias)

    assert out.shape == (N, Cout, H, W)
    # bf16 MXU operands (f32 accumulation) -> tolerance loosened vs the pure-f32 version.
    assert jnp.allclose(out, ref, atol=1e-1, rtol=1e-2), "mismatch vs reference conv"

    # Also exercise the batched-grid-step path (Nb = 2 images per step, grid of 2).
    x4 = jax.random.normal(kx, (4, Cin, H, W), dtype=jnp.float32)
    out4 = jax.block_until_ready(convertable_complete_pipeline(x4, weight, bias))
    ref4 = _reference(x4, weight, bias)
    assert out4.shape == (4, Cout, H, W)
    assert jnp.allclose(out4, ref4, atol=1e-1, rtol=1e-2), "mismatch (batched path)"

    print("KERNEL_OK")
</pallas_src>

<mosaic_0001>
module attributes {stable_mosaic.version = 11 : i64} {
  func.func @pipeline_kernel(%arg0: i32, %arg1: memref<1x8x456xf32, #tpu.memory_space<vmem>>, %arg2: memref<8x72xbf16, #tpu.memory_space<vmem>>, %arg3: memref<8x1xf32, #tpu.memory_space<vmem>>, %arg4: memref<1x8x384xf32, #tpu.memory_space<vmem>>) attributes {dimension_semantics = [#tpu.dimension_semantics<parallel>], iteration_bounds = array<i64: 2>, scalar_prefetch = 0 : i64, scratch_operands = 0 : i64, tpu.core_type = #tpu.core_type<tc>, window_params = [{transform_indices = @transform_0, window_bounds = array<i64: 1, 8, 456>}, {pipeline_mode = #tpu.pipeline_mode<synchronous>, transform_indices = @transform_1, window_bounds = array<i64: 8, 72>}, {pipeline_mode = #tpu.pipeline_mode<synchronous>, transform_indices = @transform_2, window_bounds = array<i64: 8, 1>}, {transform_indices = @transform_3, window_bounds = array<i64: 1, 8, 384>}]} {
    %c0 = arith.constant 0 : index
    %c0_0 = arith.constant 0 : index
    %0 = vector.load %arg3[%c0, %c0_0] : memref<8x1xf32, #tpu.memory_space<vmem>>, vector<8x1xf32>
    %c0_1 = arith.constant 0 : index
    %c0_2 = arith.constant 0 : index
    %c0_3 = arith.constant 0 : index
    %1 = vector.load %arg1[%c0_1, %c0_2, %c0_3] : memref<1x8x456xf32, #tpu.memory_space<vmem>>, vector<1x8x456xf32>
    %2 = vector.shape_cast %1 : vector<1x8x456xf32> to vector<8x456xf32>
    %3 = vector.extract_strided_slice %2 {offsets = [0, 0], sizes = [8, 384], strides = [1, 1]} : vector<8x456xf32> to vector<8x384xf32>
    %4 = vector.extract_strided_slice %2 {offsets = [0, 1], sizes = [8, 384], strides = [1, 1]} : vector<8x456xf32> to vector<8x384xf32>
    %5 = vector.extract_strided_slice %2 {offsets = [0, 2], sizes = [8, 384], strides = [1, 1]} : vector<8x456xf32> to vector<8x384xf32>
    %6 = vector.extract_strided_slice %2 {offsets = [0, 24], sizes = [8, 384], strides = [1, 1]} : vector<8x456xf32> to vector<8x384xf32>
    %7 = vector.extract_strided_slice %2 {offsets = [0, 25], sizes = [8, 384], strides = [1, 1]} : vector<8x456xf32> to vector<8x384xf32>
    %8 = vector.extract_strided_slice %2 {offsets = [0, 26], sizes = [8, 384], strides = [1, 1]} : vector<8x456xf32> to vector<8x384xf32>
    %9 = vector.extract_strided_slice %2 {offsets = [0, 48], sizes = [8, 384], strides = [1, 1]} : vector<8x456xf32> to vector<8x384xf32>
    %10 = vector.extract_strided_slice %2 {offsets = [0, 49], sizes = [8, 384], strides = [1, 1]} : vector<8x456xf32> to vector<8x384xf32>
    %11 = vector.extract_strided_slice %2 {offsets = [0, 50], sizes = [8, 384], strides = [1, 1]} : vector<8x456xf32> to vector<8x384xf32>
    %12 = tpu.concatenate %3, %4, %5, %6, %7, %8, %9, %10, %11 in 0 : vector<8x384xf32>, vector<8x384xf32>, vector<8x384xf32>, vector<8x384xf32>, vector<8x384xf32>, vector<8x384xf32>, vector<8x384xf32>, vector<8x384xf32>, vector<8x384xf32> -> vector<72x384xf32>
    %c0_4 = arith.constant 0 : index
    %c0_5 = arith.constant 0 : index
    %13 = vector.load %arg2[%c0_4, %c0_5] : memref<8x72xbf16, #tpu.memory_space<vmem>>, vector<8x72xbf16>
    %14 = arith.truncf %12 : vector<72x384xf32> to vector<72x384xbf16>
    %cst = arith.constant dense<0.000000e+00> : vector<8x384xf32>
    %15 = tpu.matmul %13, %14, %cst {dimension_numbers = #tpu.dot_dimension_numbers<[1], [0], [0], [1], [0, 0, 1, 1], [], []>} : vector<8x72xbf16>, vector<72x384xbf16>, vector<8x384xf32> -> vector<8x384xf32>
    %16 = vector.broadcast %0 : vector<8x1xf32> to vector<8x384xf32>
    %17 = arith.addf %15, %16 : vector<8x384xf32>
    %cst_6 = arith.constant 0.000000e+00 : f32
    %18 = vector.broadcast %cst_6 : f32 to vector<8x384xf32>
    %19 = arith.maximumf %17, %18 : vector<8x384xf32>
    %c0_7 = arith.constant 0 : index
    %c0_8 = arith.constant 0 : index
    %c0_9 = arith.constant 0 : index
    %20 = vector.load %arg4[%c0_7, %c0_8, %c0_9] : memref<1x8x384xf32, #tpu.memory_space<vmem>>, vector<1x8x384xf32>
    %21 = vector.shape_cast %20 : vector<1x8x384xf32> to vector<8x384xf32>
    %22 = vector.shape_cast %19 : vector<8x384xf32> to vector<1x8x384xf32>
    tpu.vector_store %arg4[%c0_7, %c0_8, %c0_9], %22 {strides = array<i32>} : memref<1x8x384xf32, #tpu.memory_space<vmem>>, vector<1x8x384xf32>,
    return
  }
  func.func @transform_0(%arg0: i32) -> (i32, i32, i32) {
    %c0_i32 = arith.constant 0 : i32
    %c0_i32_0 = arith.constant 0 : i32
    %c0_i32_1 = arith.constant 0 : i32
    return %arg0, %c0_i32, %c0_i32_0 : i32, i32, i32
  }
  func.func @transform_1(%arg0: i32) -> (i32, i32) {
    %c0_i32 = arith.constant 0 : i32
    %c0_i32_0 = arith.constant 0 : i32
    %c0_i32_1 = arith.constant 0 : i32
    return %c0_i32, %c0_i32_0 : i32, i32
  }
  func.func @transform_2(%arg0: i32) -> (i32, i32) {
    %c0_i32 = arith.constant 0 : i32
    %c0_i32_0 = arith.constant 0 : i32
    %c0_i32_1 = arith.constant 0 : i32
    return %c0_i32, %c0_i32_0 : i32, i32
  }
  func.func @transform_3(%arg0: i32) -> (i32, i32, i32) {
    %c0_i32 = arith.constant 0 : i32
    %c0_i32_0 = arith.constant 0 : i32
    %c0_i32_1 = arith.constant 0 : i32
    return %arg0, %c0_i32, %c0_i32_0 : i32, i32, i32
  }
}

</mosaic_0001>

<bundles_post_ra>
// kernel: tpu_custom_call.1
= control target key start
LH: loop header
LB: loop body
LE: loop exit
PB: predicated region body
PF: predicated region fallthrough
CT: control target
= control target key end

     0   :  { %8 = vsyncpa [#allocation3], 0  ;;  %s960_s0 = inlined_call_operand.hbm [shape: f32[2,8,456], index: 0, kind: input, shape index: {}]   ;;  %s961_s1 = inlined_call_operand.vmem [shape: bf16[8,72], index: 1, kind: input, shape index: {}]   ;;  %s962_s2 = inlined_call_operand.vmem [shape: f32[8,1], index: 2, kind: input, shape index: {}]   ;;  %s963_s3 = inlined_call_operand.hbm [shape: f32[2,8,384], index: 3, kind: output, shape index: {}]  }
   0x1   :  { %10 = vsyncpa [#allocation3 + $0x1], 0 }
   0x2   :  { %11 = vsyncpa [#allocation4], 0 }
   0x3   :  { %13 = vsyncpa [#allocation4 + $0x1], 0  ;;  %s767_s12 = smov 0   ;;  %s769_s13 = smov 0  }
   0x4   :  { %s771_s14 = smov 0   ;;  %s773_s15 = smov 0  }
   0x5 LB: > { %s788_s16 = sadd.s32 4294967295, %s736_s15   ;;  %s486_s17 = sadd.s32 4294967294, %s736_s15   ;;  %s736_s15 = sphi %s773_s15, %s973_s15   ;;  %s732_s14 = sphi %s771_s14, %s972_s14   ;;  %s728_s13 = sphi %s769_s13, %s971_s13   ;;  %s724_s12 = sphi %s767_s12, %s970_s12  }
   0x6   : > { %s792_s18 = sadd.s32 1, %s736_s15   ;;  %s26_s19 = sadd.s32 1, %s732_s14 }
   0x7   : > { %s23_s20 = ssub.s32 %s736_s15, %s792_s18  ;;  %p33_p0 = scmp.ne.s32.totalorder %s732_s14, %s728_s13 }
   0x8   : > { %p24_p1 = scmp.eq.s32.totalorder %s23_s20, 0  ;;  %p34_p2 = scmp.eq.s32.totalorder %s736_s15, 0 }
   0x9   : > { %p39_p3 = scmp.ne.s32.totalorder %s728_s13, %s724_s12  ;;  %p40_p4 = scmp.eq.s32.totalorder %s788_s16, 0 }
   0xa   : > { %s804_s21 = scalar_select %p24_p1, %s732_s14, %s26_s19  }
   0xb   : > { %p806_p5 = por %p34_p2, %p33_p0  ;;  %p810_p6 = por %p40_p4, %p39_p3 }
   0xc   : > { %p105_p7 = scmp.eq.s32.totalorder %s788_s16, 1  ;;  %p111_p8 = scmp.eq.s32.totalorder %s486_s17, 1 }
   0xd   : > { %p515_p10 = scmp.lt.s32.totalorder %s736_s15, 2  ;;  %s137_s26 = sand.u32 1, %s732_s14  }
   0xe   : > { %p817_p11 = por %p105_p7, %p33_p0  ;;  %p821_p12 = por %p111_p8, %p39_p3 }
   0xf   : > { %s500_s27 = sshll.u32 %s736_s15, 5  ;;  %s489_s28 = sshll.u32 %s137_s26, 5 }
  0x10   : > { %s146_s4 = scalar_lea.hbm %s960_s0, %s500_s27  ;;  %s141_s6 = scalar_lea.vmem [#allocation2], %s489_s28 }
  0x11   : > { %s148_s5 = sshll.u32 %s146_s4, 4  ;;  %s150_s7 = sshll.u32 %s141_s6, 4  ;;  %s149_s5 = int_to_ptr.hbm [resolvable:$true] %s148_s5  ;;  %s151_s7 = int_to_ptr.vmem [resolvable:$true] %s150_s7 }
  0x12   : > { %p832_p13 = pnand %p515_p10, %p806_p5  ;;  %p492_p0 = scmp.ge.s32.totalorder %s736_s15, 1 }
  0x13   : > { %p155_p1 = scmp.lt.s32.totalorder %s736_s15, 3  ;;  %s138_s9 = scalar_lea.sflag [#allocation3], %s137_s26 }
  0x14   : > { %s640_s10 = sshra.s32 %s149_s5, 4  ;;  %p644_p3 = pneg %p832_p13  ;;  %s641_s10 = int_to_ptr.hbm [resolvable:$true] %s640_s10 }
  0x15   : > { %s642_s11 = scalar_lea.hbm %s641_s10, 32  ;;  %s647_s20 = scalar_lea.hbm %s960_s0, 64 }
  0x16   : > { %p643_p2 = scmp.ne.s32.totalorder %s641_s10, %s642_s11  ;;  %p648_p5 = scmp.lt.s32.totalorder %s641_s10, %s960_s0 }
  0x17   : > { %p649_p8 = scmp.lt.s32.totalorder %s647_s20, %s642_s11 }
  0x18   : > { %p645_p4 = pnand %p644_p3, %p643_p2 }
  0x19   : > { %p650_p10 = por %p649_p8, %p648_p5 }
  0x1a   : > { %p646_p7 = pneg %p645_p4 }
  0x1c   : > { %p651_p9 = pnand %p650_p10, %p646_p7 }
  0x1e   : > { %654 = shalt.err (!%p651_p9)
}
  0x1f   : > { %510 = dma.hbm_to_vmem [thread:$0]  (!%p832_p13), %s149_s5, 512, %s151_s7, %s138_s9  }
  0x20   : > { %p156_p2 = pnand %p492_p0, %p155_p1 }
  0x21   : > { %s853_s26 = sand.u32 (!%p156_p2), 1, %s728_s13  }
  0x22   : > { %159 = sbr.rel (%p156_p2) target bundleno = 340 (0x154), region = 32  ;;  %s493_s28 = sshll.u32 (!%p156_p2), %s853_s26, 5 }
  0x23   : > { %s162_s29 = scalar_lea.sflag (!%p156_p2), [#allocation3], %s853_s26  ;;  %s165_s30 = scalar_lea.vmem (!%p156_p2), [#allocation2], %s493_s28 }
  0x27   : > { %715 = dma.done.wait (%p810_p6), %s162_s29, 512  }
  0x28   : > { %717 = vsyncadd (%p810_p6), %s162_s29, 4294966784  ;;  %v861_v0 = vld [vmem:[%s165_s30 + $0x10] sm:$0xff]  ;;  %v194_v1 = vld [vmem:[%s165_s30 + $0x18] sm:$0xff]  ;;  %s738_s4 = smov 79   ;;  %s739_s5 = smov 78   ;;  %vm312_vm0 = vcmask 637952  }
  0x29   : > { %v568_v2 = vpack.i.bf16 %v194_v1, %v861_v0  ;;  %v864_v3 = vld [vmem:[%s165_s30] sm:$0xff]  ;;  %v866_v4 = vld [vmem:[%s165_s30 + $0x8] sm:$0xff]  ;;  %s740_s6 = smov 103   ;;  %s741_s23 = smov 80   ;;  %vm344_vm1 = vcmask 1043456   ;;  %vm282_vm2 = vcmask 654336  }
  0x2a   : > { %v573_v5 = vpack.i.bf16 %v866_v4, %v864_v3  ;;  %s742_s7 = smov 102   ;;  %s743_s8 = smov 126   ;;  %vm297_vm3 = vcmask 646144   ;;  %vm252_vm4 = vcmask 842752   ;;  %vm267_vm5 = vcmask 834560   ;;  %v190_v46 = vld [vmem:[%s962_s2] sm:$0xff] }
  0x2b   : > { %569 = vrot.lane.b32.xlu1 %v568_v2, %s738_s4  ;;  %559 = vrot.lane.b32.xlu0 %v568_v2, %s739_s5  ;;  %s744_s9 = smov 104   ;;  %s745_s10 = smov 127   ;;  %v746_v52 = vmov 0   ;;  %vm222_vm6 = vcmask 1031168   ;;  %vm237_vm7 = vcmask 850944   ;;  %vm207_vm8 = vcmask 1039360  }
  0x2c   : > { %579 = vrot.lane.b32.xlu2 %v568_v2, %s740_s6  ;;  %638 = vset.pattern.permute.xlu1 %v746_v52  ;;  %vm340_vm9 = vcmask 588800   ;;  %s501_s22 = smul.u32 24, %s853_s26 }
  0x2d   : > { %639 = vset.pattern.permute.xlu0 %v746_v52  ;;  %s502_s27 = smul.u32 24, %s788_s16  ;;  %s400_s16 = scalar_lea.sflag [#allocation4], %s853_s26 }
  0x2f   : > { %s411_s30 = scalar_lea.hbm %s963_s3, %s502_s27 }
  0x33   : > { %564 = vrot.lane.b32.xlu0 %v568_v2, %s741_s23  ;;  %574 = vrot.lane.b32.xlu1 %v573_v5, %s739_s5 }
  0x34   : > { %584 = vrot.lane.b32.xlu2 %v568_v2, %s742_s7 }
  0x3b   : > { %589 = vrot.lane.b32.xlu0 %v573_v5, %s741_s23  ;;  %594 = vrot.lane.b32.xlu1 %v573_v5, %s738_s4  ;;  %s188_s4 = scalar_lea.vmem [#allocation5], %s501_s22 }
  0x3c   : > { %599 = vrot.lane.b32.xlu2 %v568_v2, %s743_s8  ;;  %s413_s5 = sshll.u32 %s188_s4, 4  ;;  %s414_s5 = int_to_ptr.vmem [resolvable:$true] %s413_s5 }
  0x43   : > { %604 = vrot.lane.b32.xlu0 %v568_v2, %s744_s9  ;;  %609 = vrot.lane.b32.xlu1 %v573_v5, %s740_s6  ;;  %s415_s6 = sshll.u32 %s411_s30, 4  ;;  %s416_s6 = int_to_ptr.hbm [resolvable:$true] %s415_s6 }
  0x44   : > { %614 = vrot.lane.b32.xlu2 %v573_v5, %s742_s7  ;;  %s684_s23 = sshra.s32 %s416_s6, 4  ;;  %s685_s23 = int_to_ptr.hbm [resolvable:$true] %s684_s23 }
  0x45   : > { %s686_s7 = scalar_lea.hbm %s685_s23, 24  ;;  %p691_p0 = scmp.lt.s32.totalorder %s685_s23, %s963_s3 }
  0x46   : > { %p687_p6 = scmp.ne.s32.totalorder %s685_s23, %s686_s7 }
  0x48   : > { %p688_p9 = pnand %p687_p6, %p817_p11 }
  0x4a   : > { %p689_p13 = pneg %p688_p9 }
  0x4b   : > { %619 = vrot.lane.b32.xlu0 %v568_v2, %s745_s10  ;;  %624 = vrot.lane.b32.xlu1 %v573_v5, %s743_s8 }
  0x4c   : > { %629 = vrot.lane.b32.xlu2 %v573_v5, %s744_s9 }
  0x53   : > { %634 = vrot.lane.b32.xlu0 %v573_v5, %s745_s10  ;;  %337 = vperm.xlu1 %638, %v190_v46   ;;  %s690_s10 = scalar_lea.hbm %s963_s3, 48 }
  0x54   : > { %p692_p1 = scmp.lt.s32.totalorder %s690_s10, %s686_s7 }
  0x56   : > { %p693_p3 = por %p692_p1, %p691_p0 }
  0x58   : > { %p694_p4 = pnand %p693_p3, %p689_p13 }
  0x86   : > { %v870_v6 = vpop.permute.xlu2 %579 }
  0x87   : > { %v582_v17 = vunpack.i.h.bf16 %v870_v6  ;;  %v581_v18 = vunpack.i.l.bf16 %v870_v6 }
  0x89   : > { %v255_v35 = vsel %vm252_vm4, %v581_v18, %v582_v17 }
  0x8e   : > { %v872_v7 = vpop.permute.xlu2 %584 }
  0x8f   : > { %v587_v19 = vunpack.i.h.bf16 %v872_v7  ;;  %v586_v20 = vunpack.i.l.bf16 %v872_v7 }
  0x91   : > { %v270_v36 = vsel %vm267_vm5, %v586_v20, %v587_v19 }
  0x92   : > { %v328_v41 = vpack.c.bf16 %v270_v36, %v255_v35 }
  0x96   : > { %v880_v23 = vpop.permute.xlu2 %599 }
  0x97   : > { %v602_v56 = vunpack.i.h.bf16 %v880_v23  ;;  %v601_v57 = vunpack.i.l.bf16 %v880_v23 }
  0x99   : > { %v225_v5 = vsel %vm222_vm6, %v601_v57, %v602_v56 }
  0x9d   : > { %v570_v8 = vpop.permute.xlu1 %569  ;;  %v560_v9 = vpop.permute.xlu0 %559 }
  0x9e   : > { %v562_v10 = vunpack.i.h.bf16 %v560_v9  ;;  %v561_v11 = vunpack.i.l.bf16 %v560_v9  ;;  %v572_v15 = vunpack.i.h.bf16 %v570_v8  ;;  %v571_v16 = vunpack.i.l.bf16 %v570_v8  ;;  %v615_v47 = vpop.permute.xlu2 %614 }
  0x9f   : > { %v616_v53 = vunpack.i.l.bf16 %v615_v47  ;;  %v617_v58 = vunpack.i.h.bf16 %v615_v47 }
  0xa0   : > { %v315_v12 = vsel %vm312_vm0, %v561_v11, %v562_v10  ;;  %v300_v29 = vsel %vm297_vm3, %v571_v16, %v572_v15 }
  0xa1   : > { %v334_v13 = vpack.c.bf16 %v315_v12, %v315_v12  ;;  %v268_v61 = vsel %vm267_vm5, %v616_v53, %v617_v58  ;;  %v269_v10 = vsel %vm267_vm5, %v617_v58, %v586_v20 }
  0xa3   : > { %v352_v14 = vsel %vm344_vm1, %v334_v13, 0 }
  0xa4   : > { %383 = vmatpush.bf16.msra.mxu2 %v352_v14 }
  0xa5   : > { %v565_v21 = vpop.permute.xlu0 %564  ;;  %v575_v22 = vpop.permute.xlu1 %574 }
  0xa6   : > { %v567_v24 = vunpack.i.h.bf16 %v565_v21  ;;  %v566_v25 = vunpack.i.l.bf16 %v565_v21  ;;  %v577_v26 = vunpack.i.h.bf16 %v575_v22  ;;  %v576_v27 = vunpack.i.l.bf16 %v575_v22  ;;  %v630_v8 = vpop.permute.xlu2 %629 }
  0xa7   : > { %v631_v13 = vunpack.i.l.bf16 %v630_v8  ;;  %v632_v17 = vunpack.i.h.bf16 %v630_v8 }
  0xa8   : > { %v285_v28 = vsel %vm282_vm2, %v566_v25, %v567_v24  ;;  %v314_v30 = vsel %vm312_vm0, %v577_v26, %v561_v11  ;;  %v313_v31 = vsel %vm312_vm0, %v576_v27, %v577_v26 }
  0xa9   : > { %v331_v32 = vpack.c.bf16 %v300_v29, %v285_v28  ;;  %v333_v33 = vpack.c.bf16 %v314_v30, %v314_v30  ;;  %v332_v34 = vpack.c.bf16 %v313_v31, %v313_v31  ;;  %v319_v30 = vld [vmem:[%s961_s1] sm:$0xf] }
  0xab   : > { %384 = vmatpush.bf16.msra.mxu2 %v331_v32  ;;  %v349_v37 = vsel %vm344_vm1, %v333_v33, 0  ;;  %v346_v38 = vsel %vm344_vm1, %v332_v34, 0 }
  0xac   : > { %370 = vmatpush.bf16.msra.mxu1 %v349_v37  ;;  %357 = vmatpush.bf16.msra.mxu0 %v346_v38 }
  0xad   : > { %v590_v39 = vpop.permute.xlu0 %589  ;;  %v595_v40 = vpop.permute.xlu1 %594 }
  0xae   : > { %v592_v42 = vunpack.i.h.bf16 %v590_v39  ;;  %v591_v43 = vunpack.i.l.bf16 %v590_v39  ;;  %v597_v44 = vunpack.i.h.bf16 %v595_v40  ;;  %v596_v45 = vunpack.i.l.bf16 %v595_v40 }
  0xaf   : > { %385 = vmatpush.bf16.msra.mxu2 %v328_v41 }
  0xb0   : > { %v283_v48 = vsel %vm282_vm2, %v591_v43, %v592_v42  ;;  %v298_v49 = vsel %vm297_vm3, %v596_v45, %v597_v44  ;;  %v284_v50 = vsel %vm282_vm2, %v592_v42, %v566_v25  ;;  %v299_v51 = vsel %vm297_vm3, %v597_v44, %v571_v16 }
  0xb1   : > { %v329_v54 = vpack.c.bf16 %v298_v49, %v283_v48  ;;  %v330_v55 = vpack.c.bf16 %v299_v51, %v284_v50 }
  0xb3   : > { %358 = vmatpush.bf16.msra.mxu0 %v329_v54  ;;  %371 = vmatpush.bf16.msra.mxu1 %v330_v55 }
  0xb5   : > { %v605_v59 = vpop.permute.xlu0 %604  ;;  %v610_v60 = vpop.permute.xlu1 %609 }
  0xb6   : > { %v607_v62 = vunpack.i.h.bf16 %v605_v59  ;;  %v606_v63 = vunpack.i.l.bf16 %v605_v59  ;;  %v612_v1 = vunpack.i.h.bf16 %v610_v60  ;;  %v611_v2 = vunpack.i.l.bf16 %v610_v60 }
  0xb8   : > { %v254_v9 = vsel %vm252_vm4, %v612_v1, %v581_v18  ;;  %v240_v11 = vsel %vm237_vm7, %v606_v63, %v607_v62  ;;  %v253_v12 = vsel %vm252_vm4, %v611_v2, %v612_v1  ;;  %v238_v18 = vsel %vm237_vm7, %v631_v13, %v632_v17 }
  0xb9   : > { %v327_v14 = vpack.c.bf16 %v269_v10, %v254_v9  ;;  %v325_v15 = vpack.c.bf16 %v240_v11, %v225_v5  ;;  %v326_v16 = vpack.c.bf16 %v268_v61, %v253_v12  ;;  %v239_v24 = vsel %vm237_vm7, %v632_v17, %v606_v63 }
  0xbb   : > { %372 = vmatpush.bf16.msra.mxu1 %v327_v14  ;;  %386 = vmatpush.bf16.msra.mxu2 %v325_v15 }
  0xbc   : > { %359 = vmatpush.bf16.msra.mxu0 %v326_v16 }
  0xbd   : > { %v620_v19 = vpop.permute.xlu0 %619  ;;  %v625_v6 = vpop.permute.xlu1 %624 }
  0xbe   : > { %v622_v7 = vunpack.i.h.bf16 %v620_v19  ;;  %v621_v21 = vunpack.i.l.bf16 %v620_v19  ;;  %v627_v20 = vunpack.i.h.bf16 %v625_v6  ;;  %v626_v22 = vunpack.i.l.bf16 %v625_v6 }
  0xc0   : > { %v224_v23 = vsel %vm222_vm6, %v627_v20, %v601_v57  ;;  %v210_v25 = vsel %vm207_vm8, %v621_v21, %v622_v7  ;;  %v223_v26 = vsel %vm222_vm6, %v626_v22, %v627_v20 }
  0xc1   : > { %v324_v27 = vpack.c.bf16 %v239_v24, %v224_v23  ;;  %v322_v28 = vpack.c.bf16 %v210_v25, %v861_v0  ;;  %v323_v29 = vpack.c.bf16 %v238_v18, %v223_v26 }
  0xc3   : > { %373 = vmatpush.bf16.msra.mxu1 %v324_v27  ;;  %387 = vmatpush.bf16.msra.mxu2 %v322_v28 }
  0xc4   : > { %360 = vmatpush.bf16.msra.mxu0 %v323_v29 }
  0xc5   : > { %v635_v31 = vpop.permute.xlu0 %634  ;;  %v338_v37 = vpop.permute.xlu1 %337 }
  0xc6   : > { %v637_v32 = vunpack.i.h.bf16 %v635_v31  ;;  %v636_v33 = vunpack.i.l.bf16 %v635_v31  ;;  %496 = vmatmul.msk.bf16.vlgmr.msra.gmra.mxu2 %vm340_vm9, %v319_v30 }
  0xc8   : > { %v208_v34 = vsel %vm207_vm8, %v636_v33, %v637_v32  ;;  %v209_v35 = vsel %vm207_vm8, %v637_v32, %v621_v21 }
  0xc9   : > { %v320_v0 = vpack.c.bf16 %v208_v34, %v864_v3  ;;  %v321_v36 = vpack.c.bf16 %v209_v35, %v866_v4 }
  0xcb   : > { %361 = vmatpush.bf16.msra.mxu0 %v320_v0  ;;  %374 = vmatpush.bf16.msra.mxu1 %v321_v36 }
  0xce   : > { %494 = vmatmul.msk.bf16.vlgmr.msra.gmra.mxu0 %vm340_vm9, %v319_v30  ;;  %495 = vmatmul.msk.bf16.vlgmr.msra.gmra.mxu1 %vm340_vm9, %v319_v30 }
 0x149   : > { %v389_v38 = vpop.f32.mrf.mxu2 }
 0x14a   : > { %v390_v39 = vadd.f32 %v389_v38, %v338_v37 }
 0x14b   : > { %v363_v40 = vpop.f32.mrf.mxu0  ;;  %v376_v41 = vpop.f32.mrf.mxu1 }
 0x14c   : > { %v364_v42 = vadd.f32 %v363_v40, %v338_v37  ;;  %v377_v3 = vadd.f32 %v376_v41, %v338_v37  ;;  %v395_v43 = vmax.f32 %v390_v39, 0.0 }
 0x14e   : > { %v393_v4 = vmax.f32 %v364_v42, 0.0  ;;  %v394_v44 = vmax.f32 %v377_v3, 0.0  ;;  %398 = vst [vmem:[%s188_s4 + $0x10] sm:$0xff] %v395_v43 }
 0x150   : > { %396 = vst [vmem:[%s188_s4] sm:$0xff] %v393_v4 }
 0x151   : > { %397 = vst [vmem:[%s188_s4 + $0x8] sm:$0xff] %v394_v44  ;;  %v391_v45 = vpop.f32.mrf.mxu2 }
 0x152   : > { %697 = shalt.err (!%p694_p4)
}
 0x153   : > { %505 = dma.vmem_to_hbm [thread:$0]  (%p817_p11), %s414_s5, 384, %s416_s6, %s400_s16   ;;  %v365_v46 = vpop.f32.mrf.mxu0  ;;  %v378_v47 = vpop.f32.mrf.mxu1 }
 0x154 PF: > { %s427_s26 = sand.u32 1, %s724_s12   ;;  %p969_p7 = scmp.ge.s32.totalorder %s736_s15, 2 }
 0x155   : > { %s428_s19 = scalar_lea.sflag [#allocation4], %s427_s26 }
 0x156   : > { %p512_p5 = pnand %p969_p7, %p821_p12 }
 0x158   : > { %p513_p8 = pneg %p512_p5 }
 0x15a   : > { %719 = dma.done.wait (%p513_p8), %s428_s19, 384  }
 0x15b   : > { %721 = vsyncadd (%p513_p8), %s428_s19, 4294966912  ;;  %p16_p11 = scmp.ge.s32.totalorder %s792_s18, 4   ;;  %s970_s12 = smov %s728_s13 }
 0x15c   : > { %s971_s13 = smov %s732_s14  ;;  %s972_s14 = smov %s804_s21 }
 0x15d   : > { %s973_s15 = smov %s792_s18  ;;  %18 = sbr.rel (!%p16_p11) target bundleno = 5 (0x5), region = 77 }
 0x162   :  { %434 = vsyncpa [#allocation3], 1 }
 0x163   :  { %436 = vsyncpa [#allocation3 + $0x1], 1 }
 0x164   :  { %437 = vsyncpa [#allocation4], 1 }
 0x165   :  { %439 = vsyncpa [#allocation4 + $0x1], 1 }

</bundles_post_ra>
